<compile_context>
chip_gen: v6e
topology: v6e:2x2x1
jax: 0.10.0
libtpu: 0.0.40
codegen_flags: <defaults>
</compile_context>

<pallas_src>
import functools

import jax
import jax.numpy as jnp
from jax.experimental import pallas as pl
from jax.experimental.pallas import tpu as pltpu


def _round_up(x, m):
    return (x + m - 1) // m * m


def _pad2d(a, shape):
    out = jnp.zeros(shape, a.dtype)
    return out.at[: a.shape[0], : a.shape[1]].set(a)


def _rnn_seq_kernel(x_ref, h0_ref, wxh_ref, whh_ref, wxo_ref, who_ref,
                    bh_ref, bo_ref, out_ref, hfin_ref, h_scr, *, out_size):
    """One grid step = one timestep for one batch tile.

    x_ref:   [TB, I_pad]   input at step t (T axis squeezed by BlockSpec)
    h0_ref:  [TB, H_pad]   initial hidden (loaded only at t == 0)
    w*_ref:  VMEM-resident weight blocks (constant index_map over t)
    h_scr:   [TB, H_pad]   VMEM scratch carrying the hidden state across t
    """
    t = pl.program_id(1)

    @pl.when(t == 0)
    def _():
        h_scr[...] = h0_ref[...]

    x = x_ref[...]
    h = h_scr[...]

    # hidden' = [x, h] @ W_i2h^T + b_i2h  (split into two MXU dots, f32 acc)
    h_new = (jnp.dot(x, wxh_ref[...], preferred_element_type=jnp.float32)
             + jnp.dot(h, whh_ref[...], preferred_element_type=jnp.float32)
             + bh_ref[...])
    h_scr[...] = h_new

    @pl.when(t == pl.num_programs(1) - 1)
    def _():
        hfin_ref[...] = h_new.astype(hfin_ref.dtype)

    # logits = [x, h] @ W_i2o^T + b_i2o   (uses the OLD hidden, like the module)
    logits = (jnp.dot(x, wxo_ref[...], preferred_element_type=jnp.float32)
              + jnp.dot(h, who_ref[...], preferred_element_type=jnp.float32)
              + bo_ref[...])

    # log_softmax over dim=1, masking the padded lanes (>= out_size).
    lane = jax.lax.broadcasted_iota(jnp.int32, logits.shape, 1)
    valid = lane < out_size
    masked = jnp.where(valid, logits, -jnp.inf)
    m = jnp.max(masked, axis=1, keepdims=True)
    shifted = masked - m
    lse = jnp.log(jnp.sum(jnp.exp(shifted), axis=1, keepdims=True))
    out = shifted - lse
    out_ref[...] = jnp.where(valid, out, 0.0).astype(out_ref.dtype)


def prepare_params(w_i2h, b_i2h, w_i2o, b_i2o,
                   input_size, hidden_size, output_size):
    """One-time: split PyTorch-layout weights into x-/h- parts, transpose to
    [in, out], and zero-pad every feature dim to a multiple of 128."""
    i_pad = _round_up(input_size, 128)
    h_pad = _round_up(hidden_size, 128)
    o_pad = _round_up(output_size, 128)

    w_xh = _pad2d(w_i2h[:, :input_size].T, (i_pad, h_pad))   # x -> hidden
    w_hh = _pad2d(w_i2h[:, input_size:].T, (h_pad, h_pad))   # h -> hidden
    w_xo = _pad2d(w_i2o[:, :input_size].T, (i_pad, o_pad))   # x -> output
    w_ho = _pad2d(w_i2o[:, input_size:].T, (h_pad, o_pad))   # h -> output
    b_h = _pad2d(b_i2h.reshape(1, -1), (1, h_pad))
    b_o = _pad2d(b_i2o.reshape(1, -1), (1, o_pad))

    return dict(w_xh=w_xh, w_hh=w_hh, w_xo=w_xo, w_ho=w_ho, b_h=b_h, b_o=b_o,
                input_size=input_size, hidden_size=hidden_size,
                output_size=output_size)


def rnn_forward_sequence(x_seq, h0, params):
    """x_seq: [T, B, input_size], h0: [B, hidden_size].
    Returns (log_softmax outputs [T, B, output_size], final hidden [B, H])."""
    T, B, input_size = x_seq.shape
    hidden_size = params["hidden_size"]
    output_size = params["output_size"]
    i_pad = params["w_xh"].shape[0]
    h_pad = params["w_hh"].shape[0]
    o_pad = params["w_xo"].shape[1]

    tb = min(_round_up(B, 8), 128)        # batch tile (sublane multiple of 8)
    b_pad = _round_up(B, tb)
    n_bt = b_pad // tb

    x_p = jnp.zeros((T, b_pad, i_pad), jnp.float32)
    x_p = x_p.at[:, :B, :input_size].set(x_seq.astype(jnp.float32))
    h0_p = jnp.zeros((b_pad, h_pad), jnp.float32)
    h0_p = h0_p.at[:B, :hidden_size].set(h0.astype(jnp.float32))

    kernel = functools.partial(_rnn_seq_kernel, out_size=output_size)

    out_p, hfin_p = pl.pallas_call(
        kernel,
        out_shape=(
            jax.ShapeDtypeStruct((T, b_pad, o_pad), jnp.float32),
            jax.ShapeDtypeStruct((b_pad, h_pad), jnp.float32),
        ),
        grid_spec=pltpu.PrefetchScalarGridSpec(
            num_scalar_prefetch=0,
            grid=(n_bt, T),
            in_specs=[
                # per-step input slice (T axis squeezed)
                pl.BlockSpec((None, tb, i_pad), lambda b, t: (t, b, 0)),
                # initial hidden (only read at t == 0)
                pl.BlockSpec((tb, h_pad), lambda b, t: (b, 0)),
                # VMEM-resident weights/biases: constant block index over t
                pl.BlockSpec((i_pad, h_pad), lambda b, t: (0, 0)),
                pl.BlockSpec((h_pad, h_pad), lambda b, t: (0, 0)),
                pl.BlockSpec((i_pad, o_pad), lambda b, t: (0, 0)),
                pl.BlockSpec((h_pad, o_pad), lambda b, t: (0, 0)),
                pl.BlockSpec((1, h_pad), lambda b, t: (0, 0)),
                pl.BlockSpec((1, o_pad), lambda b, t: (0, 0)),
            ],
            out_specs=(
                pl.BlockSpec((None, tb, o_pad), lambda b, t: (t, b, 0)),
                # final hidden: same block across t -> stays VMEM-resident
                pl.BlockSpec((tb, h_pad), lambda b, t: (b, 0)),
            ),
            scratch_shapes=[pltpu.VMEM((tb, h_pad), jnp.float32)],
        ),
        compiler_params=pltpu.CompilerParams(
            dimension_semantics=("parallel", "arbitrary")),
    )(x_p, h0_p, params["w_xh"], params["w_hh"], params["w_xo"],
      params["w_ho"], params["b_h"], params["b_o"])

    return out_p[:, :B, :output_size], hfin_p[:B, :hidden_size]


def rnn_forward(x, hidden, params):
    """Module-equivalent single step: returns (log_softmax(i2o), i2h)."""
    out_seq, h_new = rnn_forward_sequence(x[None], hidden, params)
    return out_seq[0], h_new


if __name__ == "__main__":
    input_size, hidden_size, output_size = 16, 32, 8
    batch, seq_len = 4, 8

    key = jax.random.PRNGKey(0)
    kx, k1, k2, k3, k4 = jax.random.split(key, 5)

    # Deterministic parameter init (uniform like PyTorch's Linear default).
    fan_in = input_size + hidden_size
    bound = 1.0 / (fan_in ** 0.5)
    w_i2h = jax.random.uniform(k1, (hidden_size, fan_in), jnp.float32, -bound, bound)
    b_i2h = jax.random.uniform(k2, (hidden_size,), jnp.float32, -bound, bound)
    w_i2o = jax.random.uniform(k3, (output_size, fan_in), jnp.float32, -bound, bound)
    b_i2o = jax.random.uniform(k4, (output_size,), jnp.float32, -bound, bound)

    x_seq = jax.random.normal(kx, (seq_len, batch, input_size), jnp.float32)
    h0 = jnp.zeros((batch, hidden_size), jnp.float32)       # initHidden()

    params = prepare_params(w_i2h, b_i2h, w_i2o, b_i2o,
                            input_size, hidden_size, output_size)

    out_seq, h_final = rnn_forward_sequence(x_seq, h0, params)
    jax.block_until_ready((out_seq, h_final))

    # Pure-JAX reference of the same math (unrolled module.forward).
    def ref_step(x, h):
        comb = jnp.concatenate([x, h], axis=1)
        h_new = comb @ w_i2h.T + b_i2h
        logits = comb @ w_i2o.T + b_i2o
        return jax.nn.log_softmax(logits, axis=1), h_new

    h = h0
    ref_outs = []
    for t in range(seq_len):
        o, h = ref_step(x_seq[t], h)
        ref_outs.append(o)
    ref_out_seq = jnp.stack(ref_outs)

    assert jnp.allclose(out_seq, ref_out_seq, atol=1e-4, rtol=1e-4), (
        float(jnp.max(jnp.abs(out_seq - ref_out_seq))))
    assert jnp.allclose(h_final, h, atol=1e-4, rtol=1e-4), (
        float(jnp.max(jnp.abs(h_final - h))))

    # Single-step call (exact module.forward semantics).
    out1, h1 = rnn_forward(x_seq[0], h0, params)
    ref_o1, ref_h1 = ref_step(x_seq[0], h0)
    assert jnp.allclose(out1, ref_o1, atol=1e-4, rtol=1e-4)
    assert jnp.allclose(h1, ref_h1, atol=1e-4, rtol=1e-4)

    print("KERNEL_OK")
</pallas_src>

<mosaic_0001>
module attributes {stable_mosaic.version = 11 : i64} {
  func.func @_rnn_seq_kernel(%arg0: i32, %arg1: i32, %arg2: memref<1x8x128xf32, #tpu.memory_space<vmem>>, %arg3: memref<8x128xf32, #tpu.memory_space<vmem>>, %arg4: memref<128x128xf32, #tpu.memory_space<vmem>>, %arg5: memref<128x128xf32, #tpu.memory_space<vmem>>, %arg6: memref<128x128xf32, #tpu.memory_space<vmem>>, %arg7: memref<128x128xf32, #tpu.memory_space<vmem>>, %arg8: memref<1x128xf32, #tpu.memory_space<vmem>>, %arg9: memref<1x128xf32, #tpu.memory_space<vmem>>, %arg10: memref<1x8x128xf32, #tpu.memory_space<vmem>>, %arg11: memref<8x128xf32, #tpu.memory_space<vmem>>, %arg12: memref<8x128xf32, #tpu.memory_space<vmem>>) attributes {dimension_semantics = [#tpu.dimension_semantics<parallel>, #tpu.dimension_semantics<arbitrary>], iteration_bounds = array<i64: 1, 8>, scalar_prefetch = 0 : i64, scratch_operands = 1 : i64, tpu.core_type = #tpu.core_type<tc>, window_params = [{transform_indices = @transform_0, window_bounds = array<i64: 1, 8, 128>}, {transform_indices = @transform_1, window_bounds = array<i64: 8, 128>}, {pipeline_mode = #tpu.pipeline_mode<synchronous>, transform_indices = @transform_2, window_bounds = array<i64: 128, 128>}, {pipeline_mode = #tpu.pipeline_mode<synchronous>, transform_indices = @transform_3, window_bounds = array<i64: 128, 128>}, {pipeline_mode = #tpu.pipeline_mode<synchronous>, transform_indices = @transform_4, window_bounds = array<i64: 128, 128>}, {pipeline_mode = #tpu.pipeline_mode<synchronous>, transform_indices = @transform_5, window_bounds = array<i64: 128, 128>}, {pipeline_mode = #tpu.pipeline_mode<synchronous>, transform_indices = @transform_6, window_bounds = array<i64: 1, 128>}, {pipeline_mode = #tpu.pipeline_mode<synchronous>, transform_indices = @transform_7, window_bounds = array<i64: 1, 128>}, {transform_indices = @transform_8, window_bounds = array<i64: 1, 8, 128>}, {transform_indices = @transform_9, window_bounds = array<i64: 8, 128>}]} {
    %c0_i32 = arith.constant 0 : i32
    %0 = arith.cmpi eq, %arg1, %c0_i32 : i32
    %1 = arith.extui %0 : i1 to i32
    %c0_i32_0 = arith.constant 0 : i32
    %2 = arith.cmpi ne, %1, %c0_i32_0 : i32
    scf.if %2 {
      %c0_30 = arith.constant 0 : index
      %c0_31 = arith.constant 0 : index
      %46 = vector.load %arg3[%c0_30, %c0_31] : memref<8x128xf32, #tpu.memory_space<vmem>>, vector<8x128xf32>
      %c0_32 = arith.constant 0 : index
      %c0_33 = arith.constant 0 : index
      %47 = vector.load %arg12[%c0_32, %c0_33] : memref<8x128xf32, #tpu.memory_space<vmem>>, vector<8x128xf32>
      tpu.vector_store %arg12[%c0_32, %c0_33], %46 {strides = array<i32>} : memref<8x128xf32, #tpu.memory_space<vmem>>, vector<8x128xf32>,
    } else {
    }
    %c0 = arith.constant 0 : index
    %c0_1 = arith.constant 0 : index
    %c0_2 = arith.constant 0 : index
    %3 = vector.load %arg2[%c0, %c0_1, %c0_2] : memref<1x8x128xf32, #tpu.memory_space<vmem>>, vector<1x8x128xf32>
    %4 = vector.shape_cast %3 : vector<1x8x128xf32> to vector<8x128xf32>
    %c0_3 = arith.constant 0 : index
    %c0_4 = arith.constant 0 : index
    %5 = vector.load %arg12[%c0_3, %c0_4] : memref<8x128xf32, #tpu.memory_space<vmem>>, vector<8x128xf32>
    %c0_5 = arith.constant 0 : index
    %c0_6 = arith.constant 0 : index
    %6 = vector.load %arg4[%c0_5, %c0_6] : memref<128x128xf32, #tpu.memory_space<vmem>>, vector<128x128xf32>
    %cst = arith.constant dense<0.000000e+00> : vector<8x128xf32>
    %7 = tpu.matmul %4, %6, %cst {dimension_numbers = #tpu.dot_dimension_numbers<[1], [0], [0], [1], [0, 0, 1, 1], [], []>} : vector<8x128xf32>, vector<128x128xf32>, vector<8x128xf32> -> vector<8x128xf32>
    %c0_7 = arith.constant 0 : index
    %c0_8 = arith.constant 0 : index
    %8 = vector.load %arg5[%c0_7, %c0_8] : memref<128x128xf32, #tpu.memory_space<vmem>>, vector<128x128xf32>
    %cst_9 = arith.constant dense<0.000000e+00> : vector<8x128xf32>
    %9 = tpu.matmul %5, %8, %cst_9 {dimension_numbers = #tpu.dot_dimension_numbers<[1], [0], [0], [1], [0, 0, 1, 1], [], []>} : vector<8x128xf32>, vector<128x128xf32>, vector<8x128xf32> -> vector<8x128xf32>
    %10 = arith.addf %7, %9 : vector<8x128xf32>
    %c0_10 = arith.constant 0 : index
    %c0_11 = arith.constant 0 : index
    %11 = vector.load %arg8[%c0_10, %c0_11] : memref<1x128xf32, #tpu.memory_space<vmem>>, vector<1x128xf32>
    %12 = vector.broadcast %11 : vector<1x128xf32> to vector<8x128xf32>
    %13 = arith.addf %10, %12 : vector<8x128xf32>
    %c0_12 = arith.constant 0 : index
    %c0_13 = arith.constant 0 : index
    %14 = vector.load %arg12[%c0_12, %c0_13] : memref<8x128xf32, #tpu.memory_space<vmem>>, vector<8x128xf32>
    tpu.vector_store %arg12[%c0_12, %c0_13], %13 {strides = array<i32>} : memref<8x128xf32, #tpu.memory_space<vmem>>, vector<8x128xf32>,
    %c7_i32 = arith.constant 7 : i32
    %15 = arith.cmpi eq, %arg1, %c7_i32 : i32
    %16 = arith.extui %15 : i1 to i32
    %c0_i32_14 = arith.constant 0 : i32
    %17 = arith.cmpi ne, %16, %c0_i32_14 : i32
    scf.if %17 {
      %c0_30 = arith.constant 0 : index
      %c0_31 = arith.constant 0 : index
      %46 = vector.load %arg11[%c0_30, %c0_31] : memref<8x128xf32, #tpu.memory_space<vmem>>, vector<8x128xf32>
      tpu.vector_store %arg11[%c0_30, %c0_31], %13 {strides = array<i32>} : memref<8x128xf32, #tpu.memory_space<vmem>>, vector<8x128xf32>,
    } else {
    }
    %c0_15 = arith.constant 0 : index
    %c0_16 = arith.constant 0 : index
    %18 = vector.load %arg6[%c0_15, %c0_16] : memref<128x128xf32, #tpu.memory_space<vmem>>, vector<128x128xf32>
    %cst_17 = arith.constant dense<0.000000e+00> : vector<8x128xf32>
    %19 = tpu.matmul %4, %18, %cst_17 {dimension_numbers = #tpu.dot_dimension_numbers<[1], [0], [0], [1], [0, 0, 1, 1], [], []>} : vector<8x128xf32>, vector<128x128xf32>, vector<8x128xf32> -> vector<8x128xf32>
    %c0_18 = arith.constant 0 : index
    %c0_19 = arith.constant 0 : index
    %20 = vector.load %arg7[%c0_18, %c0_19] : memref<128x128xf32, #tpu.memory_space<vmem>>, vector<128x128xf32>
    %cst_20 = arith.constant dense<0.000000e+00> : vector<8x128xf32>
    %21 = tpu.matmul %5, %20, %cst_20 {dimension_numbers = #tpu.dot_dimension_numbers<[1], [0], [0], [1], [0, 0, 1, 1], [], []>} : vector<8x128xf32>, vector<128x128xf32>, vector<8x128xf32> -> vector<8x128xf32>
    %22 = arith.addf %19, %21 : vector<8x128xf32>
    %c0_21 = arith.constant 0 : index
    %c0_22 = arith.constant 0 : index
    %23 = vector.load %arg9[%c0_21, %c0_22] : memref<1x128xf32, #tpu.memory_space<vmem>>, vector<1x128xf32>
    %24 = vector.broadcast %23 : vector<1x128xf32> to vector<8x128xf32>
    %25 = arith.addf %22, %24 : vector<8x128xf32>
    %26 = tpu.iota {dimensions = array<i32: 1>} : vector<8x128xi32>
    %c8_i32 = arith.constant 8 : i32
    %27 = vector.broadcast %c8_i32 : i32 to vector<8x128xi32>
    %28 = arith.cmpi slt, %26, %27 : vector<8x128xi32>
    %cst_23 = arith.constant 0xFF800000 : f32
    %29 = vector.broadcast %cst_23 : f32 to vector<8x128xf32>
    %30 = arith.select %28, %25, %29 : vector<8x128xi1>, vector<8x128xf32>
    %cst_24 = arith.constant dense<0xFF800000> : vector<8xf32>
    %31 = vector.multi_reduction <maximumf>, %30, %cst_24 [1] : vector<8x128xf32> to vector<8xf32>
    %32 = vector.shape_cast %31 : vector<8xf32> to vector<8x1xf32>
    %33 = vector.broadcast %32 : vector<8x1xf32> to vector<8x128xf32>
    %34 = arith.subf %30, %33 : vector<8x128xf32>
    %35 = math.exp %34 : vector<8x128xf32>
    %cst_25 = arith.constant dense<0.000000e+00> : vector<8xf32>
    %36 = vector.multi_reduction <add>, %35, %cst_25 [1] : vector<8x128xf32> to vector<8xf32>
    %37 = vector.shape_cast %36 : vector<8xf32> to vector<8x1xf32>
    %38 = math.log %37 : vector<8x1xf32>
    %39 = vector.broadcast %38 : vector<8x1xf32> to vector<8x128xf32>
    %40 = arith.subf %34, %39 : vector<8x128xf32>
    %cst_26 = arith.constant 0.000000e+00 : f32
    %41 = vector.broadcast %cst_26 : f32 to vector<8x128xf32>
    %42 = arith.select %28, %40, %41 : vector<8x128xi1>, vector<8x128xf32>
    %c0_27 = arith.constant 0 : index
    %c0_28 = arith.constant 0 : index
    %c0_29 = arith.constant 0 : index
    %43 = vector.load %arg10[%c0_27, %c0_28, %c0_29] : memref<1x8x128xf32, #tpu.memory_space<vmem>>, vector<1x8x128xf32>
    %44 = vector.shape_cast %43 : vector<1x8x128xf32> to vector<8x128xf32>
    %45 = vector.shape_cast %42 : vector<8x128xf32> to vector<1x8x128xf32>
    tpu.vector_store %arg10[%c0_27, %c0_28, %c0_29], %45 {strides = array<i32>} : memref<1x8x128xf32, #tpu.memory_space<vmem>>, vector<1x8x128xf32>,
    return
  }
  func.func @transform_0(%arg0: i32, %arg1: i32) -> (i32, i32, i32) {
    %c0_i32 = arith.constant 0 : i32
    %c0_i32_0 = arith.constant 0 : i32
    return %arg1, %arg0, %c0_i32 : i32, i32, i32
  }
  func.func @transform_1(%arg0: i32, %arg1: i32) -> (i32, i32) {
    %c0_i32 = arith.constant 0 : i32
    %c0_i32_0 = arith.constant 0 : i32
    return %arg0, %c0_i32 : i32, i32
  }
  func.func @transform_2(%arg0: i32, %arg1: i32) -> (i32, i32) {
    %c0_i32 = arith.constant 0 : i32
    %c0_i32_0 = arith.constant 0 : i32
    %c0_i32_1 = arith.constant 0 : i32
    return %c0_i32, %c0_i32_0 : i32, i32
  }
  func.func @transform_3(%arg0: i32, %arg1: i32) -> (i32, i32) {
    %c0_i32 = arith.constant 0 : i32
    %c0_i32_0 = arith.constant 0 : i32
    %c0_i32_1 = arith.constant 0 : i32
    return %c0_i32, %c0_i32_0 : i32, i32
  }
  func.func @transform_4(%arg0: i32, %arg1: i32) -> (i32, i32) {
    %c0_i32 = arith.constant 0 : i32
    %c0_i32_0 = arith.constant 0 : i32
    %c0_i32_1 = arith.constant 0 : i32
    return %c0_i32, %c0_i32_0 : i32, i32
  }
  func.func @transform_5(%arg0: i32, %arg1: i32) -> (i32, i32) {
    %c0_i32 = arith.constant 0 : i32
    %c0_i32_0 = arith.constant 0 : i32
    %c0_i32_1 = arith.constant 0 : i32
    return %c0_i32, %c0_i32_0 : i32, i32
  }
  func.func @transform_6(%arg0: i32, %arg1: i32) -> (i32, i32) {
    %c0_i32 = arith.constant 0 : i32
    %c0_i32_0 = arith.constant 0 : i32
    %c0_i32_1 = arith.constant 0 : i32
    return %c0_i32, %c0_i32_0 : i32, i32
  }
  func.func @transform_7(%arg0: i32, %arg1: i32) -> (i32, i32) {
    %c0_i32 = arith.constant 0 : i32
    %c0_i32_0 = arith.constant 0 : i32
    %c0_i32_1 = arith.constant 0 : i32
    return %c0_i32, %c0_i32_0 : i32, i32
  }
  func.func @transform_8(%arg0: i32, %arg1: i32) -> (i32, i32, i32) {
    %c0_i32 = arith.constant 0 : i32
    %c0_i32_0 = arith.constant 0 : i32
    return %arg1, %arg0, %c0_i32 : i32, i32, i32
  }
  func.func @transform_9(%arg0: i32, %arg1: i32) -> (i32, i32) {
    %c0_i32 = arith.constant 0 : i32
    %c0_i32_0 = arith.constant 0 : i32
    return %arg0, %c0_i32 : i32, i32
  }
}

</mosaic_0001>

<bundles_post_ra>
// kernel: tpu_custom_call.1
= control target key start
LH: loop header
LB: loop body
LE: loop exit
PB: predicated region body
PF: predicated region fallthrough
CT: control target
= control target key end

     0   :  { %s2052_s0 = inlined_call_operand.hbm [shape: f32[8,8,128], index: 0, kind: input, shape index: {}]   ;;  %s2053_s1 = inlined_call_operand.hbm [shape: f32[8,128], index: 1, kind: input, shape index: {}]   ;;  %s2054_s2 = inlined_call_operand.hbm [shape: f32[128,128], index: 2, kind: input, shape index: {}]   ;;  %s2055_s3 = inlined_call_operand.hbm [shape: f32[128,128], index: 3, kind: input, shape index: {}]   ;;  %s2056_s4 = inlined_call_operand.hbm [shape: f32[128,128], index: 4, kind: input, shape index: {}]   ;;  %s2057_s5 = inlined_call_operand.hbm [shape: f32[128,128], index: 5, kind: input, shape index: {}]   ;;  %s2058_s6 = inlined_call_operand.vmem [shape: f32[1,128], index: 6, kind: input, shape index: {}]   ;;  %s2059_s7 = inlined_call_operand.vmem [shape: f32[1,128], index: 7, kind: input, shape index: {}]   ;;  %s2060_s8 = inlined_call_operand.hbm [shape: f32[8,8,128], index: 8, kind: output, shape index: {0}]   ;;  %s2061_s9 = inlined_call_operand.hbm [shape: f32[8,128], index: 9, kind: output, shape index: {1}]  }
   0x1   :  { %2068 = sst [smem:[#allocation25_spill]] %s2053_s1 }
   0x2   :  { %2069 = sst [smem:[#allocation26_spill]] %s2054_s2 }
   0x3   :  { %2070 = sst [smem:[#allocation27_spill]] %s2055_s3 }
   0x4   :  { %2071 = sst [smem:[#allocation28_spill]] %s2056_s4 }
   0x5   :  { %2072 = sst [smem:[#allocation29_spill]] %s2057_s5 }
   0x6   :  { %15 = vsyncpa [#allocation4], 0 }
   0x7   :  { %17 = vsyncpa [#allocation4 + $0x1], 0 }
   0x8   :  { %18 = vsyncpa [#allocation7], 0 }
   0x9   :  { %19 = vsyncpa [#allocation10], 0 }
   0xa   :  { %20 = vsyncpa [#allocation13], 0 }
   0xb   :  { %21 = vsyncpa [#allocation5], 0 }
   0xc   :  { %23 = vsyncpa [#allocation5 + $0x1], 0 }
   0xd   :  { %24 = vsyncpa [#allocation16], 0  ;;  %s1715_s30 = smov 0   ;;  %s1717_s10 = smov 0  }
   0xe   :  { %s1719_s11 = smov 0   ;;  %s1721_s12 = smov 0  }
   0xf   :  { %s1723_s13 = smov 0   ;;  %s1725_s14 = smov 0  }
  0x10 LB: > { %2073 = sst [smem:[#allocation23_spill]] %s1647_s13  ;;  %s2065_s15 = sadd.s32 4294967295, %s1651_s14   ;;  %s1651_s14 = sphi %s1725_s14, %s30_s14   ;;  %s1647_s13 = sphi %s1723_s13, %s2096_s13   ;;  %s1643_s12 = sphi %s1721_s12, %s2095_s12   ;;  %s1639_s11 = sphi %s1719_s11, %s2099_s11   ;;  %s1635_s10 = sphi %s1717_s10, %s2098_s10   ;;  %s1631_s30 = sphi %s1715_s30, %s2097_s30  }
  0x11   : > { %p1010_p0 = scmp.ge.s32.totalorder %s1651_s14, 1  ;;  %p1749_p1 = scmp.eq.s32.totalorder %s2065_s15, 0 }
  0x12   : > { %p281_p2 = scmp.lt.s32.totalorder %s1651_s14, 9  ;;  %s1653_s18 = smov [#allocation6]  }
  0x13   : > { %s2074_s16 = scalar_select %p1749_p1, 1, 0 }
  0x14   : > { %p1754_p3 = pnand %p1010_p0, %p281_p2  ;;  %s296_s19 = sshll.u32 %s1653_s18, 4  ;;  %s297_s19 = int_to_ptr.vmem [resolvable:$true] %s296_s19 }
  0x15   : > { %s1654_s21 = smov [#allocation9]   ;;  %s1655_s23 = smov [#allocation8]  }
  0x16   : > { %s2075_s17 = scalar_select %p1754_p3, 1, 0 }
  0x17   : > { %p1273_p4 = pneg %p1754_p3  ;;  %s319_s22 = sshll.u32 %s1654_s21, 4  ;;  %s320_s22 = int_to_ptr.vmem [resolvable:$true] %s319_s22 }
  0x18   : > { %s306_s24 = sshll.u32 %s1655_s23, 4  ;;  %s1384_s26 = scalar_lea.vmem %s297_s19, 128  ;;  %s307_s24 = int_to_ptr.vmem [resolvable:$true] %s306_s24 }
  0x19   : > { %p1762_p5 = pnand %p1273_p4, %p1749_p1  ;;  %p1385_p7 = scmp.ne.s32.totalorder %s297_s19, %s1384_s26 }
  0x1a   : > { %p1392_p10 = scmp.lt.s32.totalorder %s297_s19, %s297_s19  ;;  %p1393_p11 = scmp.lt.s32.totalorder %s1384_s26, %s1384_s26 }
  0x1b   : > { %p1768_p6 = pneg %p1762_p5 }
  0x1c   : > { %p1394_p12 = por %p1393_p11, %p1392_p10 }
  0x1d   : > { %p1387_p8 = pnand %p1385_p7, %p1768_p6 }
  0x1f   : > { %p1388_p9 = pneg %p1387_p8 }
  0x21   : > { %p1395_p13 = pnand %p1394_p12, %p1388_p9 }
  0x23   : > { %1398 = shalt.err (!%p1395_p13)
}
  0x24   : > { %s2078_s1 = sld [smem:[#allocation25_spill]]  ;;  %s1410_s29 = scalar_lea.vmem %s320_s22, 2048 }
  0x25   : > { %p1411_p0 = scmp.ne.s32.totalorder %s320_s22, %s1410_s29  ;;  %p1418_p3 = scmp.lt.s32.totalorder %s320_s22, %s320_s22 }
  0x26   : > { %p1419_p7 = scmp.lt.s32.totalorder %s1410_s29, %s1410_s29 }
  0x27   : > { %p1413_p2 = pnand %p1411_p0, %p1768_p6 }
  0x28   : > { %p1420_p8 = por %p1419_p7, %p1418_p3 }
  0x29   : > { %p1414_p4 = pneg %p1413_p2 }
  0x2a   : > { %1276 = dma.hbm_to_vmem [thread:$0]  (!%p1762_p5), %s2078_s1, 128, %s297_s19, [#allocation7]  }
  0x2b   : > { %p1421_p1 = pnand %p1420_p8, %p1414_p4 }
  0x2d   : > { %1424 = shalt.err (!%p1421_p1)
}
  0x2e   : > { %s1656_s18 = smov 128   ;;  %s1657_s21 = smov 8  }
  0x2f   : > { %s2079_s3 = sld [smem:[#allocation27_spill]]  ;;  %s1436_s26 = scalar_lea.vmem %s307_s24, 2048 }
  0x30   : > { %p1437_p9 = scmp.ne.s32.totalorder %s307_s24, %s1436_s26  ;;  %p1444_p11 = scmp.lt.s32.totalorder %s307_s24, %s307_s24 }
  0x31   : > { %p1445_p1 = scmp.lt.s32.totalorder %s1436_s26, %s1436_s26 }
  0x32   : > { %p1439_p10 = pnand %p1437_p9, %p1768_p6 }
  0x33   : > { %p1446_p12 = por %p1445_p1, %p1444_p11 }
  0x34   : > { %p1440_p3 = pneg %p1439_p10 }
  0x35   : > { %1282 = dma.hbm_to_vmem [thread:$0]  (!%p1762_p5), %s2079_s3, 2048, %s320_s22, [#allocation10], %s1656_s18, %s1656_s18, %s1657_s21  }
  0x36   : > { %p1447_p13 = pnand %p1446_p12, %p1440_p3 }
  0x38   : > { %1450 = shalt.err (!%p1447_p13)
}
  0x39   : > { %s2080_s2 = sld [smem:[#allocation26_spill]]  ;;  %s1658_s22 = smov [#allocation11]  }
  0x3a   : > { %s332_s29 = sshll.u32 %s1658_s22, 4  ;;  %s1659_s23 = smov [#allocation12]   ;;  %s333_s29 = int_to_ptr.vmem [resolvable:$true] %s332_s29 }
  0x3b   : > { %s345_s19 = sshll.u32 %s1659_s23, 4  ;;  %s1462_s15 = scalar_lea.vmem %s333_s29, 2048  ;;  %s346_s19 = int_to_ptr.vmem [resolvable:$true] %s345_s19 }
  0x3c   : > { %p1463_p0 = scmp.ne.s32.totalorder %s333_s29, %s1462_s15  ;;  %p1470_p7 = scmp.lt.s32.totalorder %s333_s29, %s333_s29 }
  0x3d   : > { %p1471_p8 = scmp.lt.s32.totalorder %s1462_s15, %s1462_s15 }
  0x3e   : > { %p1465_p2 = pnand %p1463_p0, %p1768_p6 }
  0x3f   : > { %1279 = dma.hbm_to_vmem [thread:$0]  (!%p1762_p5), %s2080_s2, 2048, %s307_s24, [#allocation7], %s1656_s18, %s1656_s18, %s1657_s21  }
  0x40   : > { %p1466_p4 = pneg %p1465_p2  ;;  %p1472_p9 = por %p1471_p8, %p1470_p7 }
  0x42   : > { %p1473_p10 = pnand %p1472_p9, %p1466_p4 }
  0x44   : > { %1476 = shalt.err (!%p1473_p10)
}
  0x45   : > { %s2081_s4 = sld [smem:[#allocation28_spill]]  ;;  %s1488_s27 = scalar_lea.vmem %s346_s19, 2048 }
  0x46   : > { %p1489_p3 = scmp.ne.s32.totalorder %s346_s19, %s1488_s27  ;;  %p1496_p12 = scmp.lt.s32.totalorder %s346_s19, %s346_s19 }
  0x47   : > { %p1497_p13 = scmp.lt.s32.totalorder %s1488_s27, %s1488_s27 }
  0x48   : > { %p1491_p11 = pnand %p1489_p3, %p1768_p6 }
  0x49   : > { %p1498_p0 = por %p1497_p13, %p1496_p12 }
  0x4a   : > { %p1492_p1 = pneg %p1491_p11 }
  0x4b   : > { %1285 = dma.hbm_to_vmem [thread:$0]  (!%p1762_p5), %s2081_s4, 2048, %s333_s29, [#allocation10], %s1656_s18, %s1656_s18, %s1657_s21  }
  0x4c   : > { %p1499_p2 = pnand %p1498_p0, %p1492_p1 }
  0x4e   : > { %1502 = shalt.err (!%p1499_p2)
}
  0x4f   : > { %s2082_s5 = sld [smem:[#allocation29_spill]]  ;;  %s1009_s20 = sadd.s32 4294967294, %s1651_s14  }
  0x50   : > { %s39_s25 = sadd.s32 1, %s1647_s13  ;;  %s51_s22 = sadd.s32 1, %s1639_s11 }
  0x51   : > { %p40_p6 = scmp.ge.s32.totalorder %s39_s25, 8  ;;  %p58_p4 = scmp.ne.s32.totalorder %s1639_s11, %s1635_s10 }
  0x52   : > { %p59_p7 = scmp.eq.s32.totalorder %s1651_s14, 0  ;;  %p64_p8 = scmp.ne.s32.totalorder %s1635_s10, %s1631_s30 }
  0x53   : > { %s2101_s25 = smov (%p40_p6, %s39_s25), 0  ;;  %p2085_p10 = scmp.ne.s32.totalorder %s2074_s16, 0 }
  0x54   : > { %2083 = sst [smem:[#allocation24_spill]] %s2101_s25  ;;  %p1829_p9 = por %p59_p7, %p58_p4 }
  0x55   : > { %1288 = dma.hbm_to_vmem [thread:$0]  (!%p1762_p5), %s2082_s5, 2048, %s346_s19, [#allocation13], %s1656_s18, %s1656_s18, %s1657_s21  }
  0x56   : > { %p1835_p5 = por %p2085_p10, %p64_p8  ;;  %s46_s21 = ssub.s32 %s1647_s13, %s2101_s25 }
  0x57   : > { %s2087_s23 = sadd.s32 4294967295, %s1651_s14   ;;  %p49_p11 = scmp.eq.s32.totalorder %s46_s21, 0 }
  0x58   : > { %p1843_p3 = scmp.eq.s32.totalorder %s2087_s23, 7  ;;  %p248_p1 = scmp.eq.s32.totalorder %s1009_s20, 7 }
  0x59   : > { %p1302_p13 = scmp.lt.s32.totalorder %s1651_s14, 8  ;;  %s365_s15 = sand.u32 1, %s1639_s11  }
  0x5a   : > { %p1849_p12 = por %p1843_p3, %p58_p4  ;;  %p1857_p0 = por %p248_p1, %p64_p8 }
  0x5b   : > { %s1855_s26 = scalar_select %p49_p11, %s1639_s11, %s51_s22  }
  0x5c   : > { %s2090_s27 = scalar_select %p1857_p0, 1, 0 }
  0x5d   : > { %s1017_s28 = sshll.u32 %s365_s15, 3  ;;  %s1018_s23 = sshll.u32 %s1647_s13, 7 }
  0x5e   : > { %s375_s21 = scalar_lea.hbm %s2052_s0, %s1018_s23  ;;  %s369_s20 = scalar_lea.vmem [#allocation3], %s1017_s28 }
  0x5f   : > { %s377_s3 = sshll.u32 %s369_s20, 4  ;;  %p1868_p2 = pnand %p1302_p13, %p1829_p9  ;;  %s378_s3 = int_to_ptr.vmem [resolvable:$true] %s377_s3 }
  0x60   : > { %s366_s22 = scalar_lea.sflag [#allocation4], %s365_s15  ;;  %s1516_s5 = scalar_lea.vmem %s378_s3, 128 }
  0x61   : > { %p1505_p6 = pneg %p1868_p2  ;;  %p1517_p4 = scmp.ne.s32.totalorder %s378_s3, %s1516_s5 }
  0x62   : > { %s1660_s25 = smov [#allocation3]  }
  0x63   : > { %p1519_p7 = pnand %p1517_p4, %p1505_p6  ;;  %s1521_s13 = sshll.u32 %s1660_s25, 4  ;;  %s1522_s13 = int_to_ptr.vmem [resolvable:$false] %s1521_s13 }
  0x64   : > { %s1523_s1 = scalar_lea.vmem %s1522_s13, 256  ;;  %p1524_p10 = scmp.lt.s32.totalorder %s378_s3, %s1522_s13 }
  0x65   : > { %p1520_p8 = pneg %p1519_p7  ;;  %p1525_p11 = scmp.lt.s32.totalorder %s1523_s1, %s1516_s5 }
  0x67   : > { %p1526_p1 = por %p1525_p11, %p1524_p10 }
  0x69   : > { %p1527_p0 = pnand %p1526_p1, %p1520_p8 }
  0x6b   : > { %1530 = shalt.err (!%p1527_p0)
}
  0x6c   : > { %1292 = dma.hbm_to_vmem [thread:$0]  (!%p1868_p2), %s375_s21, 128, %s378_s3, %s366_s22  }
  0x6d   : > { %p2092_p9 = scmp.ne.s32.totalorder %s2075_s17, 0 }
  0x6e   : > { %s1879_s2 = sand.u32 (!%p2092_p9), 1, %s1635_s10  }
  0x6f   : > { %386 = sbr.rel (%p2092_p9) target bundleno = 925 (0x39d), region = 52  ;;  %s1020_s25 = sshll.u32 (!%p2092_p9), %s1879_s2, 3 }
  0x70   : > { %s389_s29 = scalar_lea.sflag (!%p2092_p9), [#allocation4], %s1879_s2  ;;  %s1883_s15 = scalar_lea.vmem (!%p2092_p9), [#allocation3], %s1020_s25 }
  0x74   : > { %1606 = dma.done.wait (%p1835_p5), %s389_s29, 128  }
  0x75   : > { %1608 = vsyncadd (%p1835_p5), %s389_s29, 4294967168  ;;  %p2093_p13 = scmp.ne.s32.totalorder %s2074_s16, 0 }
  0x77   : > { %1610 = dma.done.wait (%p2093_p13), [#allocation7], 2176  }
  0x78   : > { %1612 = vsyncadd (%p2093_p13), [#allocation7], 4294965120 }
  0x79   : > { %1614 = dma.done.wait (%p2093_p13), [#allocation10], 4096  }
  0x7a   : > { %1616 = vsyncadd (%p2093_p13), [#allocation10], 4294963200 }
  0x7b   : > { %1618 = dma.done.wait (%p2093_p13), [#allocation13], 2048  }
  0x7c   : > { %1620 = vsyncadd (%p2093_p13), [#allocation13], 4294965248  ;;  %s1901_s3 = scalar_lea.vmem [#allocation14], %s1020_s25  ;;  %p1027_p5 = scmp.ne.s32.totalorder %s1643_s12, 0 }
  0x7e   : > { %450 = sbr.rel (%p1027_p5) target bundleno = 133 (0x85), region = 80 }
  0x83   : > { %v451_v0 = vld [vmem:[#allocation6] sm:$0xff] }
  0x84   : > { %452 = vst [vmem:[#allocation2] sm:$0xff] %v451_v0 }
  0x85 PF: > { %v486_v1 = vld [vmem:[#allocation9 + $0x78] sm:$0xff]  ;;  %v1661_v3 = vmov 0.0   ;;  %v485_v4 = vld [vmem:[#allocation9 + $0x70] sm:$0xff]  ;;  %v484_v6 = vld [vmem:[#allocation9 + $0x68] sm:$0xff]  ;;  %vm1662_vm0 = vmmov 0   ;;  %p1029_p0 = scmp.ne.s32.totalorder %s1643_s12, 7 }
  0x86   : > { %v470_v2 = vld [vmem:[#allocation8 + $0x78] sm:$0xff]  ;;  %1105 = vmatprep.subr.mxu0 %v1661_v3  ;;  %1140 = vmatprep.subr.mxu1 %v1661_v3  ;;  %v469_v5 = vld [vmem:[#allocation8 + $0x70] sm:$0xff]  ;;  %v468_v7 = vld [vmem:[#allocation8 + $0x68] sm:$0xff] }
  0x87   : > { %1106 = vmatpush3.msra.mxu0 %v486_v1  ;;  %1141 = vmatpush3.msra.mxu1 %v470_v2  ;;  %v483_v8 = vld [vmem:[#allocation9 + $0x60] sm:$0xff]  ;;  %v482_v10 = vld [vmem:[#allocation9 + $0x58] sm:$0xff]  ;;  %v481_v12 = vld [vmem:[#allocation9 + $0x50] sm:$0xff] }
  0x88   : > { %1107 = vmatprep.subr.mxu0 %v1661_v3  ;;  %1142 = vmatprep.subr.mxu1 %v1661_v3  ;;  %v467_v9 = vld [vmem:[#allocation8 + $0x60] sm:$0xff]  ;;  %v466_v11 = vld [vmem:[#allocation8 + $0x58] sm:$0xff]  ;;  %v465_v13 = vld [vmem:[#allocation8 + $0x50] sm:$0xff] }
  0x89   : > { %1108 = vmatpush3.msra.mxu0 %v485_v4  ;;  %1143 = vmatpush3.msra.mxu1 %v469_v5  ;;  %v480_v14 = vld [vmem:[#allocation9 + $0x48] sm:$0xff]  ;;  %v479_v16 = vld [vmem:[#allocation9 + $0x40] sm:$0xff]  ;;  %v478_v18 = vld [vmem:[#allocation9 + $0x38] sm:$0xff] }
  0x8a   : > { %1109 = vmatprep.subr.mxu0 %v1661_v3  ;;  %1144 = vmatprep.subr.mxu1 %v1661_v3  ;;  %v464_v15 = vld [vmem:[#allocation8 + $0x48] sm:$0xff]  ;;  %v463_v17 = vld [vmem:[#allocation8 + $0x40] sm:$0xff]  ;;  %v462_v19 = vld [vmem:[#allocation8 + $0x38] sm:$0xff] }
  0x8b   : > { %1110 = vmatpush3.msra.mxu0 %v484_v6  ;;  %1145 = vmatpush3.msra.mxu1 %v468_v7  ;;  %v477_v20 = vld [vmem:[#allocation9 + $0x30] sm:$0xff]  ;;  %v476_v22 = vld [vmem:[#allocation9 + $0x28] sm:$0xff]  ;;  %v475_v24 = vld [vmem:[#allocation9 + $0x20] sm:$0xff] }
  0x8c   : > { %1111 = vmatprep.subr.mxu0 %v1661_v3  ;;  %1146 = vmatprep.subr.mxu1 %v1661_v3  ;;  %v461_v21 = vld [vmem:[#allocation8 + $0x30] sm:$0xff]  ;;  %v460_v23 = vld [vmem:[#allocation8 + $0x28] sm:$0xff]  ;;  %v459_v25 = vld [vmem:[#allocation8 + $0x20] sm:$0xff] }
  0x8d   : > { %1112 = vmatpush3.msra.mxu0 %v483_v8  ;;  %1147 = vmatpush3.msra.mxu1 %v467_v9  ;;  %v474_v26 = vld [vmem:[#allocation9 + $0x18] sm:$0xff]  ;;  %v473_v28 = vld [vmem:[#allocation9 + $0x10] sm:$0xff]  ;;  %v472_v30 = vld [vmem:[#allocation9 + $0x8] sm:$0xff] }
  0x8e   : > { %1113 = vmatprep.subr.mxu0 %v1661_v3  ;;  %1148 = vmatprep.subr.mxu1 %v1661_v3  ;;  %v458_v27 = vld [vmem:[#allocation8 + $0x18] sm:$0xff]  ;;  %v457_v29 = vld [vmem:[#allocation8 + $0x10] sm:$0xff]  ;;  %v456_v31 = vld [vmem:[#allocation8 + $0x8] sm:$0xff] }
  0x8f   : > { %1114 = vmatpush3.msra.mxu0 %v482_v10  ;;  %1149 = vmatpush3.msra.mxu1 %v466_v11  ;;  %v471_v32 = vld [vmem:[#allocation9] sm:$0xff]  ;;  %v1939_v35 = vld [vmem:[%s1883_s15] sm:$0xff] }
  0x90   : > { %1115 = vmatprep.subr.mxu0 %v1661_v3  ;;  %1150 = vmatprep.subr.mxu1 %v1661_v3  ;;  %v455_v33 = vld [vmem:[#allocation8] sm:$0xff] }
  0x91   : > { %1116 = vmatpush3.msra.mxu0 %v481_v12  ;;  %1151 = vmatpush3.msra.mxu1 %v465_v13  ;;  %v1936_v34 = vld [vmem:[#allocation2] sm:$0xff] }
  0x92   : > { %1117 = vmatprep.subr.mxu0 %v1661_v3  ;;  %1152 = vmatprep.subr.mxu1 %v1661_v3  ;;  %v1028_v38 = vld [vmem:[%s2058_s6] ss:$0 sm:$0xff] }
  0x93   : > { %1118 = vmatpush3.msra.mxu0 %v480_v14  ;;  %1153 = vmatpush3.msra.mxu1 %v464_v15 }
  0x94   : > { %1119 = vmatprep.subr.mxu0 %v1661_v3  ;;  %1154 = vmatprep.subr.mxu1 %v1661_v3 }
  0x95   : > { %1120 = vmatpush3.msra.mxu0 %v479_v16  ;;  %1155 = vmatpush3.msra.mxu1 %v463_v17 }
  0x96   : > { %1121 = vmatprep.subr.mxu0 %v1661_v3  ;;  %1156 = vmatprep.subr.mxu1 %v1661_v3 }
  0x97   : > { %1122 = vmatpush3.msra.mxu0 %v478_v18  ;;  %1157 = vmatpush3.msra.mxu1 %v462_v19 }
  0x98   : > { %1123 = vmatprep.subr.mxu0 %v1661_v3  ;;  %1158 = vmatprep.subr.mxu1 %v1661_v3 }
  0x99   : > { %1124 = vmatpush3.msra.mxu0 %v477_v20  ;;  %1159 = vmatpush3.msra.mxu1 %v461_v21 }
  0x9a   : > { %1125 = vmatprep.subr.mxu0 %v1661_v3  ;;  %1160 = vmatprep.subr.mxu1 %v1661_v3 }
  0x9b   : > { %1126 = vmatpush3.msra.mxu0 %v476_v22  ;;  %1161 = vmatpush3.msra.mxu1 %v460_v23 }
  0x9c   : > { %1127 = vmatprep.subr.mxu0 %v1661_v3  ;;  %1162 = vmatprep.subr.mxu1 %v1661_v3 }
  0x9d   : > { %1128 = vmatpush3.msra.mxu0 %v475_v24  ;;  %1163 = vmatpush3.msra.mxu1 %v459_v25 }
  0x9e   : > { %1129 = vmatprep.subr.mxu0 %v1661_v3  ;;  %1164 = vmatprep.subr.mxu1 %v1661_v3 }
  0x9f   : > { %1130 = vmatpush3.msra.mxu0 %v474_v26  ;;  %1165 = vmatpush3.msra.mxu1 %v458_v27 }
  0xa0   : > { %1131 = vmatprep.subr.mxu0 %v1661_v3  ;;  %1166 = vmatprep.subr.mxu1 %v1661_v3 }
  0xa1   : > { %1132 = vmatpush3.msra.mxu0 %v473_v28  ;;  %1167 = vmatpush3.msra.mxu1 %v457_v29 }
  0xa2   : > { %1133 = vmatprep.subr.mxu0 %v1661_v3  ;;  %1168 = vmatprep.subr.mxu1 %v1661_v3 }
  0xa3   : > { %1134 = vmatpush3.msra.mxu0 %v472_v30  ;;  %1169 = vmatpush3.msra.mxu1 %v456_v31 }
  0xa4   : > { %1135 = vmatprep.subr.mxu0 %v1661_v3  ;;  %1170 = vmatprep.subr.mxu1 %v1661_v3 }
  0xa5   : > { %1136 = vmatpush3.msra.mxu0 %v471_v32  ;;  %1137 = vmatprep.mubr.msk.f32.mxu0 %vm1662_vm0, %v1661_v3 }
  0xa6   : > { %1171 = vmatpush3.msra.mxu1 %v455_v33  ;;  %1172 = vmatprep.mubr.msk.f32.mxu1 %vm1662_vm0, %v1661_v3 }
  0xa7   : > { %1138 = vmatmul.mubr.f32.vlgmr.msra.gmra.mxu0 %v1936_v34  ;;  %1173 = vmatmul.mubr.f32.vlgmr.msra.gmra.mxu1 %v1939_v35 }
 0x167   : > { %v553_v36 = vpop.f32.mrf.mxu0  ;;  %v623_v37 = vpop.f32.mrf.mxu1 }
 0x168   : > { %v624_v39 = vadd.f32 %v623_v37, %v553_v36  ;;  %639 = sbr.rel (%p1029_p0) target bundleno = 366 (0x16e), region = 84 }
 0x169   : > { %v1139_v40 = vpop.f32.mrf.mxu0  ;;  %v1174_v41 = vpop.f32.mrf.mxu1 }
 0x16a   : > { %v634_v42 = vadd.f32 %v1028_v38, %v624_v39 }
 0x16c   : > { %635 = vst [vmem:[#allocation2] sm:$0xff] %v634_v42 }
 0x16d   : > { %640 = vst [vmem:[#allocation15] sm:$0xff] %v634_v42 }
 0x16e PF: > { %1175 = vmatprep.subr.mxu0 %v1661_v3  ;;  %1210 = vmatprep.subr.mxu1 %v1661_v3  ;;  %v672_v43 = vld [vmem:[#allocation12 + $0x78] sm:$0xff]  ;;  %v671_v45 = vld [vmem:[#allocation12 + $0x70] sm:$0xff]  ;;  %v670_v47 = vld [vmem:[#allocation12 + $0x68] sm:$0xff]  ;;  %v821_v12 = vlaneseq  ;;  %s1663_s17 = smov [#allocation15]  }
 0x16f   : > { %v656_v44 = vld [vmem:[#allocation11 + $0x78] sm:$0xff]  ;;  %1176 = vmatpush3.msra.mxu0 %v672_v43  ;;  %v655_v46 = vld [vmem:[#allocation11 + $0x70] sm:$0xff]  ;;  %v654_v48 = vld [vmem:[#allocation11 + $0x68] sm:$0xff]  ;;  %1207 = vmatprep.mubr.msk.f32.mxu0 %vm1662_vm0, %v1661_v3  ;;  %s865_s18 = sshll.u32 %s1663_s17, 4  ;;  %s866_s18 = int_to_ptr.vmem [resolvable:$true] %s865_s18 }
 0x170   : > { %1211 = vmatpush3.msra.mxu1 %v656_v44  ;;  %1177 = vmatprep.subr.mxu0 %v1661_v3  ;;  %v669_v49 = vld [vmem:[#allocation12 + $0x60] sm:$0xff]  ;;  %v668_v51 = vld [vmem:[#allocation12 + $0x58] sm:$0xff]  ;;  %v667_v53 = vld [vmem:[#allocation12 + $0x50] sm:$0xff]  ;;  %v822_v13 = vand.u32 127, %v821_v12  ;;  %s1531_s28 = scalar_lea.vmem %s866_s18, 128  ;;  %p1538_p7 = scmp.lt.s32.totalorder %s866_s18, %s866_s18 }
 0x171   : > { %1212 = vmatprep.subr.mxu1 %v1661_v3  ;;  %1178 = vmatpush3.msra.mxu0 %v671_v45  ;;  %v653_v50 = vld [vmem:[#allocation11 + $0x60] sm:$0xff]  ;;  %v652_v52 = vld [vmem:[#allocation11 + $0x58] sm:$0xff]  ;;  %v651_v54 = vld [vmem:[#allocation11 + $0x50] sm:$0xff]  ;;  %p1532_p2 = scmp.ne.s32.totalorder %s866_s18, %s1531_s28  ;;  %p1539_p8 = scmp.lt.s32.totalorder %s1531_s28, %s1531_s28 }
 0x172   : > { %1213 = vmatpush3.msra.mxu1 %v655_v46  ;;  %1179 = vmatprep.subr.mxu0 %v1661_v3  ;;  %v666_v55 = vld [vmem:[#allocation12 + $0x48] sm:$0xff]  ;;  %v665_v57 = vld [vmem:[#allocation12 + $0x40] sm:$0xff]  ;;  %v664_v59 = vld [vmem:[#allocation12 + $0x38] sm:$0xff]  ;;  %vm823_vm1 = vcmp.lt.s32.totalorder %v822_v13, 8 }
 0x173   : > { %1214 = vmatprep.subr.mxu1 %v1661_v3  ;;  %1180 = vmatpush3.msra.mxu0 %v670_v47  ;;  %v650_v56 = vld [vmem:[#allocation11 + $0x48] sm:$0xff]  ;;  %v649_v58 = vld [vmem:[#allocation11 + $0x40] sm:$0xff]  ;;  %v648_v60 = vld [vmem:[#allocation11 + $0x38] sm:$0xff]  ;;  %p1533_p6 = pnand %p1532_p2, %p1843_p3  ;;  %p1540_p10 = por %p1539_p8, %p1538_p7 }
 0x174   : > { %1215 = vmatpush3.msra.mxu1 %v654_v48  ;;  %1181 = vmatprep.subr.mxu0 %v1661_v3  ;;  %v663_v61 = vld [vmem:[#allocation12 + $0x30] sm:$0xff]  ;;  %v662_v63 = vld [vmem:[#allocation12 + $0x28] sm:$0xff]  ;;  %v661_v1 = vld [vmem:[#allocation12 + $0x20] sm:$0xff] }
 0x175   : > { %1216 = vmatprep.subr.mxu1 %v1661_v3  ;;  %1182 = vmatpush3.msra.mxu0 %v669_v49  ;;  %v647_v62 = vld [vmem:[#allocation11 + $0x30] sm:$0xff]  ;;  %v646_v0 = vld [vmem:[#allocation11 + $0x28] sm:$0xff]  ;;  %v645_v2 = vld [vmem:[#allocation11 + $0x20] sm:$0xff]  ;;  %p1534_p4 = pneg %p1533_p6 }
 0x176   : > { %1217 = vmatpush3.msra.mxu1 %v653_v50  ;;  %1183 = vmatprep.subr.mxu0 %v1661_v3  ;;  %v660_v4 = vld [vmem:[#allocation12 + $0x18] sm:$0xff]  ;;  %v659_v6 = vld [vmem:[#allocation12 + $0x10] sm:$0xff]  ;;  %v658_v8 = vld [vmem:[#allocation12 + $0x8] sm:$0xff] }
 0x177   : > { %1218 = vmatprep.subr.mxu1 %v1661_v3  ;;  %1184 = vmatpush3.msra.mxu0 %v668_v51  ;;  %v644_v5 = vld [vmem:[#allocation11 + $0x18] sm:$0xff]  ;;  %v643_v7 = vld [vmem:[#allocation11 + $0x10] sm:$0xff]  ;;  %v642_v9 = vld [vmem:[#allocation11 + $0x8] sm:$0xff]  ;;  %p1541_p11 = pnand %p1540_p10, %p1534_p4 }
 0x178   : > { %1219 = vmatpush3.msra.mxu1 %v652_v52  ;;  %1185 = vmatprep.subr.mxu0 %v1661_v3  ;;  %v657_v10 = vld [vmem:[#allocation12] sm:$0xff] }
 0x179   : > { %1220 = vmatprep.subr.mxu1 %v1661_v3  ;;  %1186 = vmatpush3.msra.mxu0 %v667_v53  ;;  %v641_v11 = vld [vmem:[#allocation11] sm:$0xff] }
 0x17a   : > { %1221 = vmatpush3.msra.mxu1 %v651_v54  ;;  %1187 = vmatprep.subr.mxu0 %v1661_v3  ;;  %v1030_v16 = vld [vmem:[%s2059_s7] ss:$0 sm:$0xff] }
 0x17b   : > { %1222 = vmatprep.subr.mxu1 %v1661_v3  ;;  %1188 = vmatpush3.msra.mxu0 %v666_v55 }
 0x17c   : > { %1223 = vmatpush3.msra.mxu1 %v650_v56  ;;  %1189 = vmatprep.subr.mxu0 %v1661_v3 }
 0x17d   : > { %1224 = vmatprep.subr.mxu1 %v1661_v3  ;;  %1190 = vmatpush3.msra.mxu0 %v665_v57 }
 0x17e   : > { %1225 = vmatpush3.msra.mxu1 %v649_v58  ;;  %1191 = vmatprep.subr.mxu0 %v1661_v3 }
 0x17f   : > { %1226 = vmatprep.subr.mxu1 %v1661_v3  ;;  %1192 = vmatpush3.msra.mxu0 %v664_v59 }
 0x180   : > { %1227 = vmatpush3.msra.mxu1 %v648_v60  ;;  %1193 = vmatprep.subr.mxu0 %v1661_v3 }
 0x181   : > { %1228 = vmatprep.subr.mxu1 %v1661_v3  ;;  %1194 = vmatpush3.msra.mxu0 %v663_v61 }
 0x182   : > { %1229 = vmatpush3.msra.mxu1 %v647_v62  ;;  %1195 = vmatprep.subr.mxu0 %v1661_v3 }
 0x183   : > { %1230 = vmatprep.subr.mxu1 %v1661_v3  ;;  %1196 = vmatpush3.msra.mxu0 %v662_v63 }
 0x184   : > { %1231 = vmatpush3.msra.mxu1 %v646_v0  ;;  %1197 = vmatprep.subr.mxu0 %v1661_v3 }
 0x185   : > { %1232 = vmatprep.subr.mxu1 %v1661_v3  ;;  %1198 = vmatpush3.msra.mxu0 %v661_v1 }
 0x186   : > { %1233 = vmatpush3.msra.mxu1 %v645_v2  ;;  %1199 = vmatprep.subr.mxu0 %v1661_v3 }
 0x187   : > { %1234 = vmatprep.subr.mxu1 %v1661_v3  ;;  %1200 = vmatpush3.msra.mxu0 %v660_v4 }
 0x188   : > { %1235 = vmatpush3.msra.mxu1 %v644_v5  ;;  %1201 = vmatprep.subr.mxu0 %v1661_v3 }
 0x189   : > { %1236 = vmatprep.subr.mxu1 %v1661_v3  ;;  %1202 = vmatpush3.msra.mxu0 %v659_v6 }
 0x18a   : > { %1237 = vmatpush3.msra.mxu1 %v643_v7  ;;  %1203 = vmatprep.subr.mxu0 %v1661_v3 }
 0x18b   : > { %1238 = vmatprep.subr.mxu1 %v1661_v3  ;;  %1204 = vmatpush3.msra.mxu0 %v658_v8 }
 0x18c   : > { %1239 = vmatpush3.msra.mxu1 %v642_v9  ;;  %1205 = vmatprep.subr.mxu0 %v1661_v3 }
 0x18d   : > { %1240 = vmatprep.subr.mxu1 %v1661_v3  ;;  %1206 = vmatpush3.msra.mxu0 %v657_v10 }
 0x18e   : > { %1241 = vmatpush3.msra.mxu1 %v641_v11  ;;  %1242 = vmatprep.mubr.msk.f32.mxu1 %vm1662_vm0, %v1661_v3 }
 0x18f   : > { %1208 = vmatmul.mubr.f32.vlgmr.msra.gmra.mxu0 %v1936_v34  ;;  %1243 = vmatmul.mubr.f32.vlgmr.msra.gmra.mxu1 %v1939_v35 }
 0x24f   : > { %v739_v14 = vpop.f32.mrf.mxu0  ;;  %v809_v15 = vpop.f32.mrf.mxu1 }
 0x250   : > { %v810_v17 = vadd.f32 %v809_v15, %v739_v14 }
 0x251   : > { %v1209_v18 = vpop.f32.mrf.mxu0  ;;  %v1244_v19 = vpop.f32.mrf.mxu1 }
 0x252   : > { %v820_v20 = vadd.f32 %v1030_v16, %v810_v17 }
 0x254   : > { %v824_v3 = vsel %vm823_vm1, %v820_v20, -inf }
 0x255   : > { %825 = vmax.xlane.f32.xlu0 %v824_v3 }
 0x2de   : > { %v826_v21 = vpop.xlane.xlu0 %825 }
 0x2df   : > { %v827_v22 = vsub.f32 %v824_v3, %v826_v21 }
 0x2e1   : > { %v828_v23 = vmul.f32 1.442695, %v827_v22 }
 0x2e3   : > { %1369 = vpow2.f32 %v828_v23 }
 0x2f0   : > { %v1370_v24 = vpop.eup %1369 }
 0x2f1   : > { %830 = vadd.xlane.f32.xlu0 %v1370_v24 }
 0x2f2   : > { %1544 = shalt.err (!%p1541_p11)
}
 0x2f3   : > { %1269 = dma.vmem_to_hbm [thread:$0]  (%p1843_p3), %s866_s18, 128, %s2061_s9, [#allocation16]  }
 0x2f4   : > { %s1032_s20 = sshll.u32 %s1643_s12, 7  ;;  %s852_s22 = sshll.u32 %s1901_s3, 4  ;;  %s853_s22 = int_to_ptr.vmem [resolvable:$true] %s852_s22 }
 0x2f5   : > { %s2005_s29 = scalar_lea.hbm %s2060_s8, %s1032_s20  ;;  %s838_s15 = scalar_lea.sflag [#allocation5], %s1879_s2 }
 0x2f6   : > { %s1555_s4 = scalar_lea.vmem %s853_s22, 128  ;;  %s1664_s5 = smov [#allocation14]  }
 0x2f7   : > { %p1556_p1 = scmp.ne.s32.totalorder %s853_s22, %s1555_s4  ;;  %s1559_s13 = sshll.u32 %s1664_s5, 4  ;;  %s1560_s13 = int_to_ptr.vmem [resolvable:$false] %s1559_s13 }
 0x2f8   : > { %s1561_s12 = scalar_lea.vmem %s1560_s13, 256  ;;  %p1562_p5 = scmp.lt.s32.totalorder %s853_s22, %s1560_s13 }
 0x2f9   : > { %p1557_p9 = pnand %p1556_p1, %p1849_p12  ;;  %p1563_p0 = scmp.lt.s32.totalorder %s1561_s12, %s1555_s4 }
 0x2fb   : > { %p1558_p13 = pneg %p1557_p9  ;;  %p1564_p2 = por %p1563_p0, %p1562_p5 }
 0x2fd   : > { %p1565_p6 = pnand %p1564_p2, %p1558_p13 }
 0x37a   : > { %v831_v25 = vpop.xlane.xlu0 %830 }
 0x37b   : > { %1371 = vlog2.f32 %v831_v25 }
 0x388   : > { %v1372_v26 = vpop.eup %1371 }
 0x389   : > { %v833_v27 = vmul.f32 0.6931472, %v1372_v26 }
 0x38b   : > { %v834_v28 = vsub.f32 %v827_v22, %v833_v27 }
 0x38d   : > { %v835_v29 = vsel %vm823_vm1, %v834_v28, 0.0 }
 0x38e   : > { %836 = vst [vmem:[%s1901_s3] sm:$0xff] %v835_v29 }
 0x38f   : > { %1568 = shalt.err (!%p1565_p6)
}
 0x390   : > { %s1569_s3 = scalar_lea.hbm %s2005_s29, 128  ;;  %s1573_s17 = scalar_lea.hbm %s2060_s8, 1024 }
 0x391   : > { %p1570_p4 = scmp.ne.s32.totalorder %s2005_s29, %s1569_s3  ;;  %p1574_p10 = scmp.lt.s32.totalorder %s2005_s29, %s2060_s8 }
 0x392   : > { %p1575_p11 = scmp.lt.s32.totalorder %s1573_s17, %s1569_s3 }
 0x393   : > { %p1571_p7 = pnand %p1570_p4, %p1849_p12 }
 0x394   : > { %p1576_p1 = por %p1575_p11, %p1574_p10 }
 0x395   : > { %p1572_p8 = pneg %p1571_p7 }
 0x397   : > { %p1577_p9 = pnand %p1576_p1, %p1572_p8 }
 0x399   : > { %1580 = shalt.err (!%p1577_p9)
}
 0x39a   : > { %1267 = dma.vmem_to_hbm [thread:$0]  (%p1849_p12), %s853_s22, 128, %s2005_s29, %s838_s15  }
 0x39b   : > { %1622 = dma.done.wait (%p1843_p3), [#allocation16], 128  }
 0x39c   : > { %1624 = vsyncadd (%p1843_p3), [#allocation16], 4294967168 }
 0x39d PF: > { %p1310_p13 = scmp.ge.s32.totalorder %s1651_s14, 2  ;;  %s881_s23 = sand.u32 1, %s1631_s30  }
 0x39e   : > { %p2094_p5 = scmp.ne.s32.totalorder %s2090_s27, 0  ;;  %s882_s21 = scalar_lea.sflag [#allocation5], %s881_s23 }
 0x3a0   : > { %p1294_p0 = pnand %p1310_p13, %p2094_p5 }
 0x3a2   : > { %p1295_p2 = pneg %p1294_p0 }
 0x3a4   : > { %1626 = dma.done.wait (%p1295_p2), %s882_s21, 128  }
 0x3a5   : > { %1628 = vsyncadd (%p1295_p2), %s882_s21, 4294967168  ;;  %s30_s14 = sadd.s32 1, %s1651_s14   ;;  %s2095_s12 = sld [smem:[#allocation23_spill]] }
 0x3a6   : > { %p27_p12 = scmp.ge.s32.totalorder %s30_s14, 10   ;;  %s2096_s13 = sld [smem:[#allocation24_spill]] }
 0x3a7   : > { %s2097_s30 = smov %s1635_s10  ;;  %s2098_s10 = smov %s1639_s11 }
 0x3a8   : > { %s2099_s11 = smov %s1855_s26  ;;  %29 = sbr.rel (!%p27_p12) target bundleno = 16 (0x10), region = 135 }
 0x3ad   :  { %887 = vsyncpa [#allocation4], 1 }
 0x3ae   :  { %889 = vsyncpa [#allocation4 + $0x1], 1 }
 0x3af   :  { %890 = vsyncpa [#allocation7], 1 }
 0x3b0   :  { %891 = vsyncpa [#allocation10], 1 }
 0x3b1   :  { %892 = vsyncpa [#allocation13], 1 }
 0x3b2   :  { %893 = vsyncpa [#allocation5], 1 }
 0x3b3   :  { %895 = vsyncpa [#allocation5 + $0x1], 1 }
 0x3b4   :  { %896 = vsyncpa [#allocation16], 1 }

</bundles_post_ra>
